<compile_context>
chip_gen: v5e
topology: v5e:2x2
jax: 0.10.0
libtpu: 0.0.40
codegen_flags: <defaults>
</compile_context>

<pallas_src>
import jax
import jax.numpy as jnp
from jax.experimental import pallas as pl
from jax.experimental.pallas import tpu as pltpu


def _round_up(x, m):
    return ((x + m - 1) // m) * m


# ---------------------------------------------------------------------------
# Fused Pallas kernel: relu(cat(a, t) @ W1^T + b1) @ W2^T + b2
# (concat never materialized: cat(a,t)@W1^T == a@W1[:, :A]^T + t@W1[:, A:]^T)
# ---------------------------------------------------------------------------
def _diffusion_mlp_kernel(audio_ref, text_ref, w1a_ref, w1t_ref, b1_ref,
                          w2_ref, b2_ref, o_ref):
    # Inputs arrive f32; cast to bf16 in vregs for the MXU (f32 accumulate).
    a = audio_ref[...].astype(jnp.bfloat16)
    t = text_ref[...].astype(jnp.bfloat16)
    h = jnp.dot(a, w1a_ref[...], preferred_element_type=jnp.float32)
    h = h + jnp.dot(t, w1t_ref[...], preferred_element_type=jnp.float32)
    h = jnp.maximum(h + b1_ref[...], 0.0)                       # bias + ReLU in f32
    out = jnp.dot(h.astype(jnp.bfloat16), w2_ref[...],
                  preferred_element_type=jnp.float32)
    o_ref[...] = (out + b2_ref[...]).astype(o_ref.dtype)        # lane-dense store


# ---------------------------------------------------------------------------
# One-time parameter prep (do NOT call per denoising step)
# ---------------------------------------------------------------------------
def prepare_params(params, audio_dim):
    """Split W1 by input stream, transpose to (in, out), cast to bf16, and
    zero-pad the fc2 output dim up to a multiple of 128 lanes."""
    w1, b1 = params["w1"], params["b1"]     # (H, A+T), (H,)
    w2, b2 = params["w2"], params["b2"]     # (A, H),   (A,)
    H, AT = w1.shape
    A = audio_dim
    T = AT - A
    Ap = A if A % 128 == 0 else _round_up(A, 128)   # lane-dense output width

    w1a = jnp.transpose(w1[:, :A]).astype(jnp.bfloat16)          # (A, H)
    w1t = jnp.transpose(w1[:, A:]).astype(jnp.bfloat16)          # (T, H)
    w2m = jnp.transpose(w2).astype(jnp.bfloat16)                 # (H, A)
    b1r = b1.astype(jnp.float32).reshape(1, H)
    b2r = b2.astype(jnp.float32).reshape(1, A)
    if Ap != A:
        w2m = jnp.pad(w2m, ((0, 0), (0, Ap - A)))                # (H, Ap)
        b2r = jnp.pad(b2r, ((0, 0), (0, Ap - A)))                # (1, Ap)

    return dict(w1a=w1a, w1t=w1t, b1=b1r, w2=w2m, b2=b2r,
                audio_dim=A, text_dim=T, hidden=H, out_pad=Ap)


# ---------------------------------------------------------------------------
# Forward wrapper
# ---------------------------------------------------------------------------
def diffusion_forward(audio, text, prepped, *, block_b=2048):
    """audio: (B, A) f32, text: (B, T) f32 -> (B, A) f32."""
    B, A = audio.shape
    Bt, T = text.shape
    assert B == Bt and A == prepped["audio_dim"] and T == prepped["text_dim"]
    H, Ap = prepped["hidden"], prepped["out_pad"]

    # Batch tiling: single full block for small B; otherwise >=2 grid steps
    # (v7x has 2 TensorCores sharded via "parallel"), capped at block_b rows.
    if B <= 512:
        tb = B                                    # block == full array dims
    else:
        tb = min(_round_up(block_b, 8), _round_up(pl.cdiv(B, 2), 8))
    grid_b = pl.cdiv(B, tb)                       # partial last block is masked

    out = pl.pallas_call(
        _diffusion_mlp_kernel,
        out_shape=jax.ShapeDtypeStruct((B, Ap), jnp.float32),
        grid=(grid_b,),
        in_specs=[
            pl.BlockSpec((tb, A), lambda i: (i, 0)),   # audio rows (f32)
            pl.BlockSpec((tb, T), lambda i: (i, 0)),   # text rows  (f32)
            pl.BlockSpec((A, H), lambda i: (0, 0)),    # W1[:, :A]^T (replicated)
            pl.BlockSpec((T, H), lambda i: (0, 0)),    # W1[:, A:]^T (replicated)
            pl.BlockSpec((1, H), lambda i: (0, 0)),    # b1
            pl.BlockSpec((H, Ap), lambda i: (0, 0)),   # W2^T, lane-padded
            pl.BlockSpec((1, Ap), lambda i: (0, 0)),   # b2,   lane-padded
        ],
        out_specs=pl.BlockSpec((tb, Ap), lambda i: (i, 0)),
        compiler_params=pltpu.CompilerParams(
            dimension_semantics=("parallel",),          # megacore sharding on v7x
            vmem_limit_bytes=32 * 1024 * 1024,          # headroom on v7x 64 MiB
        ),
    )(audio, text, prepped["w1a"], prepped["w1t"], prepped["b1"],
      prepped["w2"], prepped["b2"])

    if Ap != A:
        out = out[:, :A]                           # drop lane padding once
    return out


# ---------------------------------------------------------------------------
# Pure-JAX references
# ---------------------------------------------------------------------------
def reference_forward_f32(audio, text, params):
    x = jnp.concatenate([audio, text], axis=-1)
    h = jnp.maximum(x @ params["w1"].T + params["b1"], 0.0)
    return h @ params["w2"].T + params["b2"]


def reference_forward_kernel_precision(audio, text, params, audio_dim):
    """Mirrors the kernel's exact dtype path (bf16 operands incl. the hidden
    activations, f32 accumulation and bias/ReLU)."""
    A = audio_dim
    w1a = params["w1"][:, :A].T.astype(jnp.bfloat16)
    w1t = params["w1"][:, A:].T.astype(jnp.bfloat16)
    w2m = params["w2"].T.astype(jnp.bfloat16)
    a = audio.astype(jnp.bfloat16)
    t = text.astype(jnp.bfloat16)
    h = jnp.dot(a, w1a, preferred_element_type=jnp.float32)
    h = h + jnp.dot(t, w1t, preferred_element_type=jnp.float32)
    h = jnp.maximum(h + params["b1"].astype(jnp.float32), 0.0)
    out = jnp.dot(h.astype(jnp.bfloat16), w2m, preferred_element_type=jnp.float32)
    return out + params["b2"].astype(jnp.float32)


# ---------------------------------------------------------------------------
if __name__ == "__main__":
    key = jax.random.PRNGKey(0)
    AUDIO_DIM, TEXT_DIM, HIDDEN = 64, 32, 512
    k1, k2, k3, k4, ka, kt = jax.random.split(key, 6)

    params = dict(
        w1=0.05 * jax.random.normal(k1, (HIDDEN, AUDIO_DIM + TEXT_DIM), jnp.float32),
        b1=0.10 * jax.random.normal(k2, (HIDDEN,), jnp.float32),
        w2=0.05 * jax.random.normal(k3, (AUDIO_DIM, HIDDEN), jnp.float32),
        b2=0.10 * jax.random.normal(k4, (AUDIO_DIM,), jnp.float32),
    )
    prepped = prepare_params(params, AUDIO_DIM)     # one-time weight prep

    def check(batch):
        kka, kkt = jax.random.split(jax.random.fold_in(key, batch))
        audio = jax.random.normal(kka, (batch, AUDIO_DIM), jnp.float32)
        text = jax.random.normal(kkt, (batch, TEXT_DIM), jnp.float32)
        out = jax.block_until_ready(diffusion_forward(audio, text, prepped))
        assert out.shape == (batch, AUDIO_DIM)
        ref_k = reference_forward_kernel_precision(audio, text, params, AUDIO_DIM)
        if not bool(jnp.allclose(out, ref_k, atol=2e-3, rtol=2e-3)):
            raise AssertionError(f"B={batch}: mismatch vs kernel-precision reference")
        ref_f = reference_forward_f32(audio, text, params)
        if not bool(jnp.allclose(out, ref_f, atol=5e-2, rtol=5e-2)):
            raise AssertionError(f"B={batch}: drifted too far from f32 reference")

    check(8)      # small batch: single full-array block
    check(600)    # multi-block grid (2 steps) with a masked partial last block

    print("KERNEL_OK")
</pallas_src>

<mosaic_0001>
module attributes {stable_mosaic.version = 11 : i64} {
  func.func @_diffusion_mlp_kernel(%arg0: i32, %arg1: memref<8x64xf32, #tpu.memory_space<vmem>>, %arg2: memref<8x32xf32, #tpu.memory_space<vmem>>, %arg3: memref<64x512xbf16, #tpu.memory_space<vmem>>, %arg4: memref<32x512xbf16, #tpu.memory_space<vmem>>, %arg5: memref<1x512xf32, #tpu.memory_space<vmem>>, %arg6: memref<512x128xbf16, #tpu.memory_space<vmem>>, %arg7: memref<1x128xf32, #tpu.memory_space<vmem>>, %arg8: memref<8x128xf32, #tpu.memory_space<vmem>>) attributes {dimension_semantics = [#tpu.dimension_semantics<parallel>], iteration_bounds = array<i64: 1>, scalar_prefetch = 0 : i64, scratch_operands = 0 : i64, tpu.core_type = #tpu.core_type<tc>, window_params = [{transform_indices = @transform_0, window_bounds = array<i64: 8, 64>}, {transform_indices = @transform_1, window_bounds = array<i64: 8, 32>}, {pipeline_mode = #tpu.pipeline_mode<synchronous>, transform_indices = @transform_2, window_bounds = array<i64: 64, 512>}, {pipeline_mode = #tpu.pipeline_mode<synchronous>, transform_indices = @transform_3, window_bounds = array<i64: 32, 512>}, {pipeline_mode = #tpu.pipeline_mode<synchronous>, transform_indices = @transform_4, window_bounds = array<i64: 1, 512>}, {pipeline_mode = #tpu.pipeline_mode<synchronous>, transform_indices = @transform_5, window_bounds = array<i64: 512, 128>}, {pipeline_mode = #tpu.pipeline_mode<synchronous>, transform_indices = @transform_6, window_bounds = array<i64: 1, 128>}, {transform_indices = @transform_7, window_bounds = array<i64: 8, 128>}]} {
    %c0 = arith.constant 0 : index
    %c0_0 = arith.constant 0 : index
    %0 = vector.load %arg1[%c0, %c0_0] : memref<8x64xf32, #tpu.memory_space<vmem>>, vector<8x64xf32>
    %1 = arith.truncf %0 : vector<8x64xf32> to vector<8x64xbf16>
    %c0_1 = arith.constant 0 : index
    %c0_2 = arith.constant 0 : index
    %2 = vector.load %arg2[%c0_1, %c0_2] : memref<8x32xf32, #tpu.memory_space<vmem>>, vector<8x32xf32>
    %3 = arith.truncf %2 : vector<8x32xf32> to vector<8x32xbf16>
    %c0_3 = arith.constant 0 : index
    %c0_4 = arith.constant 0 : index
    %4 = vector.load %arg3[%c0_3, %c0_4] : memref<64x512xbf16, #tpu.memory_space<vmem>>, vector<64x512xbf16>
    %cst = arith.constant dense<0.000000e+00> : vector<8x512xf32>
    %5 = tpu.matmul %1, %4, %cst {dimension_numbers = #tpu.dot_dimension_numbers<[1], [0], [0], [1], [0, 0, 1, 1], [], []>} : vector<8x64xbf16>, vector<64x512xbf16>, vector<8x512xf32> -> vector<8x512xf32>
    %c0_5 = arith.constant 0 : index
    %c0_6 = arith.constant 0 : index
    %6 = vector.load %arg4[%c0_5, %c0_6] : memref<32x512xbf16, #tpu.memory_space<vmem>>, vector<32x512xbf16>
    %cst_7 = arith.constant dense<0.000000e+00> : vector<8x512xf32>
    %7 = tpu.matmul %3, %6, %cst_7 {dimension_numbers = #tpu.dot_dimension_numbers<[1], [0], [0], [1], [0, 0, 1, 1], [], []>} : vector<8x32xbf16>, vector<32x512xbf16>, vector<8x512xf32> -> vector<8x512xf32>
    %8 = arith.addf %5, %7 : vector<8x512xf32>
    %c0_8 = arith.constant 0 : index
    %c0_9 = arith.constant 0 : index
    %9 = vector.load %arg5[%c0_8, %c0_9] : memref<1x512xf32, #tpu.memory_space<vmem>>, vector<1x512xf32>
    %10 = vector.broadcast %9 : vector<1x512xf32> to vector<8x512xf32>
    %11 = arith.addf %8, %10 : vector<8x512xf32>
    %cst_10 = arith.constant 0.000000e+00 : f32
    %12 = vector.broadcast %cst_10 : f32 to vector<8x512xf32>
    %13 = arith.maximumf %11, %12 : vector<8x512xf32>
    %14 = arith.truncf %13 : vector<8x512xf32> to vector<8x512xbf16>
    %c0_11 = arith.constant 0 : index
    %c0_12 = arith.constant 0 : index
    %15 = vector.load %arg6[%c0_11, %c0_12] : memref<512x128xbf16, #tpu.memory_space<vmem>>, vector<512x128xbf16>
    %cst_13 = arith.constant dense<0.000000e+00> : vector<8x128xf32>
    %16 = tpu.matmul %14, %15, %cst_13 {dimension_numbers = #tpu.dot_dimension_numbers<[1], [0], [0], [1], [0, 0, 1, 1], [], []>} : vector<8x512xbf16>, vector<512x128xbf16>, vector<8x128xf32> -> vector<8x128xf32>
    %c0_14 = arith.constant 0 : index
    %c0_15 = arith.constant 0 : index
    %17 = vector.load %arg7[%c0_14, %c0_15] : memref<1x128xf32, #tpu.memory_space<vmem>>, vector<1x128xf32>
    %18 = vector.broadcast %17 : vector<1x128xf32> to vector<8x128xf32>
    %19 = arith.addf %16, %18 : vector<8x128xf32>
    %c0_16 = arith.constant 0 : index
    %c0_17 = arith.constant 0 : index
    %20 = vector.load %arg8[%c0_16, %c0_17] : memref<8x128xf32, #tpu.memory_space<vmem>>, vector<8x128xf32>
    tpu.vector_store %arg8[%c0_16, %c0_17], %19 {strides = array<i32>} : memref<8x128xf32, #tpu.memory_space<vmem>>, vector<8x128xf32>,
    return
  }
  func.func @transform_0(%arg0: i32) -> (i32, i32) {
    %c0_i32 = arith.constant 0 : i32
    %c0_i32_0 = arith.constant 0 : i32
    return %arg0, %c0_i32 : i32, i32
  }
  func.func @transform_1(%arg0: i32) -> (i32, i32) {
    %c0_i32 = arith.constant 0 : i32
    %c0_i32_0 = arith.constant 0 : i32
    return %arg0, %c0_i32 : i32, i32
  }
  func.func @transform_2(%arg0: i32) -> (i32, i32) {
    %c0_i32 = arith.constant 0 : i32
    %c0_i32_0 = arith.constant 0 : i32
    %c0_i32_1 = arith.constant 0 : i32
    return %c0_i32, %c0_i32_0 : i32, i32
  }
  func.func @transform_3(%arg0: i32) -> (i32, i32) {
    %c0_i32 = arith.constant 0 : i32
    %c0_i32_0 = arith.constant 0 : i32
    %c0_i32_1 = arith.constant 0 : i32
    return %c0_i32, %c0_i32_0 : i32, i32
  }
  func.func @transform_4(%arg0: i32) -> (i32, i32) {
    %c0_i32 = arith.constant 0 : i32
    %c0_i32_0 = arith.constant 0 : i32
    %c0_i32_1 = arith.constant 0 : i32
    return %c0_i32, %c0_i32_0 : i32, i32
  }
  func.func @transform_5(%arg0: i32) -> (i32, i32) {
    %c0_i32 = arith.constant 0 : i32
    %c0_i32_0 = arith.constant 0 : i32
    %c0_i32_1 = arith.constant 0 : i32
    return %c0_i32, %c0_i32_0 : i32, i32
  }
  func.func @transform_6(%arg0: i32) -> (i32, i32) {
    %c0_i32 = arith.constant 0 : i32
    %c0_i32_0 = arith.constant 0 : i32
    %c0_i32_1 = arith.constant 0 : i32
    return %c0_i32, %c0_i32_0 : i32, i32
  }
  func.func @transform_7(%arg0: i32) -> (i32, i32) {
    %c0_i32 = arith.constant 0 : i32
    %c0_i32_0 = arith.constant 0 : i32
    return %arg0, %c0_i32 : i32, i32
  }
}

</mosaic_0001>

<bundles_post_ra>
// kernel: tpu_custom_call.1
= control target key start
LH: loop header
LB: loop body
LE: loop exit
PB: predicated region body
PF: predicated region fallthrough
CT: control target
= control target key end

     0   :  { %12 = vsyncpa [#allocation3], 0  ;;  %s1288_s0 = inlined_call_operand.hbm [shape: f32[8,64], index: 0, kind: input, shape index: {}]   ;;  %s1289_s1 = inlined_call_operand.hbm [shape: f32[8,32], index: 1, kind: input, shape index: {}]   ;;  %s1290_s2 = inlined_call_operand.hbm [shape: bf16[64,512], index: 2, kind: input, shape index: {}]   ;;  %s1291_s3 = inlined_call_operand.hbm [shape: bf16[32,512], index: 3, kind: input, shape index: {}]   ;;  %s1292_s4 = inlined_call_operand.hbm [shape: f32[1,512], index: 4, kind: input, shape index: {}]   ;;  %s1293_s5 = inlined_call_operand.hbm [shape: bf16[512,128], index: 5, kind: input, shape index: {}]   ;;  %s1294_s6 = inlined_call_operand.vmem [shape: f32[1,128], index: 6, kind: input, shape index: {}]   ;;  %s1295_s7 = inlined_call_operand.hbm [shape: f32[8,128], index: 7, kind: output, shape index: {}]  }
   0x1   :  { %13 = vsyncpa [#allocation6], 0 }
   0x2   :  { %14 = vsyncpa [#allocation9], 0 }
   0x3   :  { %15 = vsyncpa [#allocation12], 0  ;;  %s33_s26 = sshll.u32 %s1289_s1, 4  ;;  %s34_s26 = int_to_ptr.hbm [resolvable:$true] %s33_s26 }
   0x4   :  { %16 = vsyncpa [#allocation4], 0  ;;  %s1209_s27 = smov [#allocation5]   ;;  %s56_s8 = sshll.u32 %s1291_s3, 4  ;;  %s57_s8 = int_to_ptr.hbm [resolvable:$true] %s56_s8 }
   0x5   :  { %s35_s28 = sshll.u32 %s1209_s27, 4  ;;  %s1210_s9 = smov [#allocation8]   ;;  %s36_s28 = int_to_ptr.vmem [resolvable:$true] %s35_s28 }
   0x6   :  { %38 = dma.hbm_to_vmem [thread:$0]  %s34_s26, 128, %s36_s28, [#allocation6]  }
   0x7   :  { %s58_s10 = sshll.u32 %s1210_s9, 4  ;;  %s22_s13 = sshll.u32 %s1288_s0, 4  ;;  %s59_s10 = int_to_ptr.vmem [resolvable:$true] %s58_s10  ;;  %s23_s13 = int_to_ptr.hbm [resolvable:$true] %s22_s13 }
   0x8   :  { %s1211_s1 = smov 256   ;;  %s1212_s14 = smov 16  }
   0x9   :  { %64 = dma.hbm_to_vmem [thread:$0]  %s57_s8, 1024, %s59_s10, [#allocation9], %s1211_s1, %s1211_s1, %s1212_s14  }
   0xa   :  { %s43_s17 = sshll.u32 %s1290_s2, 4  ;;  %s1213_s18 = smov [#allocation2]   ;;  %s44_s17 = int_to_ptr.hbm [resolvable:$true] %s43_s17 }
   0xb   :  { %s24_s19 = sshll.u32 %s1213_s18, 4  ;;  %s1214_s3 = smov [#allocation7]   ;;  %s25_s19 = int_to_ptr.vmem [resolvable:$true] %s24_s19 }
   0xc   :  { %27 = dma.hbm_to_vmem [thread:$0]  %s23_s13, 128, %s25_s19, [#allocation3]  }
   0xd   :  { %s45_s20 = sshll.u32 %s1214_s3, 4  ;;  %s70_s0 = sshll.u32 %s1292_s4, 4  ;;  %s46_s20 = int_to_ptr.vmem [resolvable:$true] %s45_s20  ;;  %s71_s0 = int_to_ptr.hbm [resolvable:$true] %s70_s0 }
   0xe   :  { %51 = dma.hbm_to_vmem [thread:$0]  %s44_s17, 2048, %s46_s20, [#allocation6], %s1211_s1, %s1211_s1, %s1212_s14  }
   0xf   :  { %s80_s25 = sshll.u32 %s1293_s5, 4  ;;  %s1215_s26 = smov [#allocation10]   ;;  %s81_s25 = int_to_ptr.hbm [resolvable:$true] %s80_s25 }
  0x10   :  { %s72_s2 = sshll.u32 %s1215_s26, 4  ;;  %s1216_s27 = smov [#allocation11]   ;;  %s73_s2 = int_to_ptr.vmem [resolvable:$true] %s72_s2 }
  0x11   :  { %75 = dma.hbm_to_vmem [thread:$0]  %s71_s0, 64, %s73_s2, [#allocation9]  }
  0x12   :  { %s82_s28 = sshll.u32 %s1216_s27, 4  ;;  %s1217_s29 = smov 64   ;;  %s83_s28 = int_to_ptr.vmem [resolvable:$true] %s82_s28 }
  0x13   :  { %s1218_s30 = smov 4  }
  0x14   :  { %88 = dma.hbm_to_vmem [thread:$0]  %s81_s25, 4096, %s83_s28, [#allocation12], %s1217_s29, %s1217_s29, %s1218_s30  }
  0x15   :  { %1199 = dma.done.wait [#allocation3], 128  }
  0x16   :  { %1200 = vsyncadd [#allocation3], 4294967168 }
  0x17   :  { %1201 = dma.done.wait [#allocation6], 2176  }
  0x18   :  { %1202 = vsyncadd [#allocation6], 4294965120 }
  0x19   :  { %1203 = dma.done.wait [#allocation9], 1088  }
  0x1a   :  { %1204 = vsyncadd [#allocation9], 4294966208 }
  0x1b   :  { %1205 = dma.done.wait [#allocation12], 4096  }
  0x1c   :  { %1206 = vsyncadd [#allocation12], 4294963200  ;;  %v749_v0 = vld [vmem:[#allocation8 + $0x20] sm:$0xf]  ;;  %v985_v1 = vld [vmem:[#allocation8 + $0x2c] sm:$0xf0] }
  0x1d   :  { %v983_v2 = vld [vmem:[#allocation8 + $0x24] sm:$0xf]  ;;  %v750_v3 = vor.u32 %v985_v1, %v749_v0  ;;  %v751_v4 = vld [vmem:[#allocation8 + $0x30] sm:$0xf0]  ;;  %v757_v5 = vld [vmem:[#allocation8 + $0x28] sm:$0xf] }
  0x1e   :  { %v986_v6 = vld [vmem:[#allocation8 + $0x34] sm:$0xf0]  ;;  %v754_v7 = vor.u32 %v983_v2, %v751_v4  ;;  %v984_v9 = vld [vmem:[#allocation8 + $0x2c] sm:$0xf]  ;;  %v759_v10 = vld [vmem:[#allocation8 + $0x38] sm:$0xf0] }
  0x1f   :  { %v758_v8 = vor.u32 %v986_v6, %v757_v5  ;;  %v733_v11 = vld [vmem:[#allocation8] sm:$0xf]  ;;  %194 = vmatpush.bf16.msra.mxu0 %v750_v3  ;;  %v762_v12 = vor.u32 %v984_v9, %v759_v10  ;;  %v981_v13 = vld [vmem:[#allocation8 + $0xc] sm:$0xf0]  ;;  %v979_v14 = vld [vmem:[#allocation8 + $0x4] sm:$0xf] }
  0x20   :  { %v735_v15 = vld [vmem:[#allocation8 + $0x10] sm:$0xf0]  ;;  %207 = vmatpush.bf16.msra.mxu1 %v754_v7  ;;  %v734_v16 = vor.u32 %v981_v13, %v733_v11  ;;  %v741_v18 = vld [vmem:[#allocation8 + $0x8] sm:$0xf]  ;;  %v982_v19 = vld [vmem:[#allocation8 + $0x14] sm:$0xf0] }
  0x21   :  { %220 = vmatpush.bf16.msra.mxu2 %v758_v8  ;;  %v738_v17 = vor.u32 %v979_v14, %v735_v15  ;;  %v980_v20 = vld [vmem:[#allocation8 + $0xc] sm:$0xf]  ;;  %233 = vmatpush.bf16.msra.mxu3 %v762_v12  ;;  %v742_v21 = vor.u32 %v982_v19, %v741_v18  ;;  %v743_v22 = vld [vmem:[#allocation8 + $0x18] sm:$0xf0]  ;;  %vm184_vm0 = vcmask 261120   ;;  %v116_v9 = vld [vmem:[#allocation2] sm:$0xff] }
  0x22   :  { %v118_v23 = vld [vmem:[#allocation5] sm:$0xff]  ;;  %v825_v24 = vld [vmem:[#allocation7 + $0x68] sm:$0xf]  ;;  %v746_v25 = vor.u32 %v980_v20, %v743_v22  ;;  %v976_v28 = vld [vmem:[#allocation7 + $0x6c] sm:$0xf]  ;;  %v117_v13 = vpack.c.bf16 %v116_v9, %v116_v9  ;;  %vm320_vm1 = vcmask 523264  }
  0x23   :  { %v119_v26 = vpack.c.bf16 %v118_v23, %v118_v23  ;;  %v978_v27 = vld [vmem:[#allocation7 + $0x74] sm:$0xf0]  ;;  %v827_v29 = vld [vmem:[#allocation7 + $0x78] sm:$0xf0]  ;;  %195 = vmatpush.bf16.msra.mxu0 %v734_v16  ;;  %v817_v32 = vld [vmem:[#allocation7 + $0x60] sm:$0xf] }
  0x24   :  { %v826_v30 = vor.u32 %v978_v27, %v825_v24  ;;  %v830_v31 = vor.u32 %v976_v28, %v827_v29  ;;  %v977_v33 = vld [vmem:[#allocation7 + $0x6c] sm:$0xf0]  ;;  %v975_v34 = vld [vmem:[#allocation7 + $0x64] sm:$0xf]  ;;  %208 = vmatpush.bf16.msra.mxu1 %v738_v17  ;;  %v819_v36 = vld [vmem:[#allocation7 + $0x70] sm:$0xf0] }
  0x25   :  { %221 = vmatpush.bf16.msra.mxu2 %v742_v21  ;;  %v818_v35 = vor.u32 %v977_v33, %v817_v32  ;;  %v809_v37 = vld [vmem:[#allocation7 + $0x48] sm:$0xf]  ;;  %v974_v38 = vld [vmem:[#allocation7 + $0x54] sm:$0xf0]  ;;  %234 = vmatpush.bf16.msra.mxu3 %v746_v25  ;;  %v822_v39 = vor.u32 %v975_v34, %v819_v36  ;;  %v972_v41 = vld [vmem:[#allocation7 + $0x4c] sm:$0xf] }
  0x26   :  { %v810_v40 = vor.u32 %v974_v38, %v809_v37  ;;  %v811_v42 = vld [vmem:[#allocation7 + $0x58] sm:$0xf0]  ;;  %v801_v43 = vld [vmem:[#allocation7 + $0x40] sm:$0xf]  ;;  %763 = vmatmul.msk.bf16.vlgmr.msra.gmra.mxu0 %vm184_vm0, %v119_v26  ;;  %v973_v45 = vld [vmem:[#allocation7 + $0x4c] sm:$0xf0] }
  0x27   :  { %v814_v44 = vor.u32 %v972_v41, %v811_v42  ;;  %v971_v46 = vld [vmem:[#allocation7 + $0x44] sm:$0xf]  ;;  %v803_v47 = vld [vmem:[#allocation7 + $0x50] sm:$0xf0]  ;;  %764 = vmatmul.msk.bf16.vlgmr.msra.gmra.mxu1 %vm184_vm0, %v119_v26  ;;  %v793_v48 = vld [vmem:[#allocation7 + $0x28] sm:$0xf]  ;;  %328 = vmatpush.bf16.msrb.mxu0 %v818_v35  ;;  %v802_v51 = vor.u32 %v973_v45, %v801_v43 }
  0x28   :  { %765 = vmatmul.msk.bf16.vlgmr.msra.gmra.mxu2 %vm184_vm0, %v119_v26  ;;  %v970_v49 = vld [vmem:[#allocation7 + $0x34] sm:$0xf0]  ;;  %v968_v50 = vld [vmem:[#allocation7 + $0x2c] sm:$0xf]  ;;  %766 = vmatmul.msk.bf16.vlgmr.msra.gmra.mxu3 %vm184_vm0, %v119_v26  ;;  %v795_v52 = vld [vmem:[#allocation7 + $0x38] sm:$0xf0]  ;;  %v806_v53 = vor.u32 %v971_v46, %v803_v47 }
  0x29   :  { %354 = vmatpush.bf16.msrb.mxu2 %v826_v30  ;;  %367 = vmatpush.bf16.msrb.mxu3 %v830_v31  ;;  %v794_v54 = vor.u32 %v970_v49, %v793_v48  ;;  %v785_v55 = vld [vmem:[#allocation7 + $0x20] sm:$0xf]  ;;  %v969_v56 = vld [vmem:[#allocation7 + $0x2c] sm:$0xf0]  ;;  %v967_v57 = vld [vmem:[#allocation7 + $0x24] sm:$0xf]  ;;  %v798_v58 = vor.u32 %v968_v50, %v795_v52 }
  0x2a   :  { %341 = vmatpush.bf16.msrb.mxu1 %v822_v39  ;;  %v787_v59 = vld [vmem:[#allocation7 + $0x30] sm:$0xf0]  ;;  %v777_v60 = vld [vmem:[#allocation7 + $0x8] sm:$0xf]  ;;  %v966_v61 = vld [vmem:[#allocation7 + $0x14] sm:$0xf0]  ;;  %v786_v0 = vor.u32 %v969_v56, %v785_v55 }
  0x2b   :  { %v964_v62 = vld [vmem:[#allocation7 + $0xc] sm:$0xf]  ;;  %v779_v63 = vld [vmem:[#allocation7 + $0x18] sm:$0xf0]  ;;  %329 = vmatpush.bf16.msrb.mxu0 %v802_v51  ;;  %v790_v1 = vor.u32 %v967_v57, %v787_v59  ;;  %v778_v2 = vor.u32 %v966_v61, %v777_v60  ;;  %v769_v3 = vld [vmem:[#allocation7] sm:$0xf] }
  0x2c   :  { %v965_v4 = vld [vmem:[#allocation7 + $0xc] sm:$0xf0]  ;;  %v782_v5 = vor.u32 %v964_v62, %v779_v63  ;;  %v963_v6 = vld [vmem:[#allocation7 + $0x4] sm:$0xf]  ;;  %v771_v7 = vld [vmem:[#allocation7 + $0x10] sm:$0xf0] }
  0x2d   :  { %355 = vmatpush.bf16.msrb.mxu2 %v810_v40  ;;  %368 = vmatpush.bf16.msrb.mxu3 %v814_v44  ;;  %v770_v8 = vor.u32 %v965_v4, %v769_v3  ;;  %v774_v10 = vor.u32 %v963_v6, %v771_v7  ;;  %v994_v11 = vld [vmem:[#allocation11 + $0x38] sm:$0xff]  ;;  %v993_v14 = vld [vmem:[#allocation11 + $0x30] sm:$0xff]  ;;  %v992_v18 = vld [vmem:[#allocation11 + $0x28] sm:$0xff]  ;;  %s1219_s8 = smov [#allocation13]   ;;  %s718_s12 = sshll.u32 %s1295_s7, 4  ;;  %s719_s12 = int_to_ptr.hbm [resolvable:$true] %s718_s12 }
  0x2e   :  { %342 = vmatpush.bf16.msrb.mxu1 %v806_v53  ;;  %v1002_v12 = vld [vmem:[#allocation11 + $0x78] sm:$0xff]  ;;  %v1001_v15 = vld [vmem:[#allocation11 + $0x70] sm:$0xff]  ;;  %v1000_v19 = vld [vmem:[#allocation11 + $0x68] sm:$0xff]  ;;  %s716_s9 = sshll.u32 %s1219_s8, 4  ;;  %s717_s9 = int_to_ptr.vmem [resolvable:$true] %s716_s9 }
  0x2f   :  { %330 = vmatpush.bf16.msrb.mxu0 %v786_v0  ;;  %v1010_v16 = vld [vmem:[#allocation11 + $0xb8] sm:$0xff]  ;;  %v1009_v20 = vld [vmem:[#allocation11 + $0xb0] sm:$0xff]  ;;  %v991_v22 = vld [vmem:[#allocation11 + $0x20] sm:$0xff] }
  0x30   :  { %v1018_v17 = vld [vmem:[#allocation11 + $0xf8] sm:$0xff]  ;;  %v1017_v21 = vld [vmem:[#allocation11 + $0xf0] sm:$0xff]  ;;  %v999_v23 = vld [vmem:[#allocation11 + $0x60] sm:$0xff] }
  0x31   :  { %356 = vmatpush.bf16.msrb.mxu2 %v794_v54  ;;  %369 = vmatpush.bf16.msrb.mxu3 %v798_v58  ;;  %v1008_v24 = vld [vmem:[#allocation11 + $0xa8] sm:$0xff]  ;;  %v990_v26 = vld [vmem:[#allocation11 + $0x18] sm:$0xff]  ;;  %v1007_v28 = vld [vmem:[#allocation11 + $0xa0] sm:$0xff] }
  0x32   :  { %343 = vmatpush.bf16.msrb.mxu1 %v790_v1  ;;  %v1016_v25 = vld [vmem:[#allocation11 + $0xe8] sm:$0xff]  ;;  %v998_v27 = vld [vmem:[#allocation11 + $0x58] sm:$0xff]  ;;  %v1015_v29 = vld [vmem:[#allocation11 + $0xe0] sm:$0xff] }
  0x33   :  { %331 = vmatpush.bf16.msrb.mxu0 %v770_v8  ;;  %v989_v30 = vld [vmem:[#allocation11 + $0x10] sm:$0xff]  ;;  %v1006_v32 = vld [vmem:[#allocation11 + $0x98] sm:$0xff]  ;;  %v988_v34 = vld [vmem:[#allocation11 + $0x8] sm:$0xff] }
  0x34   :  { %v997_v31 = vld [vmem:[#allocation11 + $0x50] sm:$0xff]  ;;  %v1014_v33 = vld [vmem:[#allocation11 + $0xd8] sm:$0xff]  ;;  %v996_v35 = vld [vmem:[#allocation11 + $0x48] sm:$0xff] }
  0x35   :  { %357 = vmatpush.bf16.msrb.mxu2 %v778_v2  ;;  %370 = vmatpush.bf16.msrb.mxu3 %v782_v5  ;;  %v1005_v36 = vld [vmem:[#allocation11 + $0x90] sm:$0xff]  ;;  %v987_v38 = vld [vmem:[#allocation11] sm:$0xff]  ;;  %v1004_v40 = vld [vmem:[#allocation11 + $0x88] sm:$0xff] }
  0x36   :  { %344 = vmatpush.bf16.msrb.mxu1 %v774_v10  ;;  %831 = vmatmul.msk.bf16.vlgmr.msrb.gmra.mxu0 %vm320_vm1, %v117_v13  ;;  %v1013_v37 = vld [vmem:[#allocation11 + $0xd0] sm:$0xff]  ;;  %v995_v39 = vld [vmem:[#allocation11 + $0x40] sm:$0xff]  ;;  %v1012_v41 = vld [vmem:[#allocation11 + $0xc8] sm:$0xff] }
  0x37   :  { %658 = vmatpush.bf16.msra.mxu0 %v994_v11  ;;  %v1003_v42 = vld [vmem:[#allocation11 + $0x80] sm:$0xff]  ;;  %v376_v50 = vld [vmem:[#allocation10] sm:$0xf] }
  0x38   :  { %833 = vmatmul.msk.bf16.vlgmr.msrb.gmra.mxu2 %vm320_vm1, %v117_v13  ;;  %834 = vmatmul.msk.bf16.vlgmr.msrb.gmra.mxu3 %vm320_vm1, %v117_v13  ;;  %v1011_v43 = vld [vmem:[#allocation11 + $0xc0] sm:$0xff]  ;;  %v378_v53 = vperm.slane %v376_v50, 0  ;;  %v379_v55 = vperm.slane %v376_v50, 1  ;;  %v380_v62 = vperm.slane %v376_v50, 2  ;;  %v381_v1 = vperm.slane %v376_v50, 3 }
  0x39   :  { %832 = vmatmul.msk.bf16.vlgmr.msrb.gmra.mxu1 %vm320_vm1, %v117_v13  ;;  %684 = vmatpush.bf16.msra.mxu2 %v1010_v16 }
  0x3a   :  { %671 = vmatpush.bf16.msra.mxu1 %v1002_v12  ;;  %697 = vmatpush.bf16.msra.mxu3 %v1018_v17 }
  0x3b   :  { %659 = vmatpush.bf16.msra.mxu0 %v993_v14 }
  0x3d   :  { %685 = vmatpush.bf16.msra.mxu2 %v1009_v20 }
  0x3e   :  { %672 = vmatpush.bf16.msra.mxu1 %v1001_v15  ;;  %698 = vmatpush.bf16.msra.mxu3 %v1017_v21 }
  0x3f   :  { %660 = vmatpush.bf16.msra.mxu0 %v992_v18 }
  0x41   :  { %686 = vmatpush.bf16.msra.mxu2 %v1008_v24 }
  0x42   :  { %673 = vmatpush.bf16.msra.mxu1 %v1000_v19  ;;  %699 = vmatpush.bf16.msra.mxu3 %v1016_v25  ;;  %v1030_v19 = vld [vmem:[%s1294_s6] ss:$0 sm:$0xff] }
  0x43   :  { %661 = vmatpush.bf16.msra.mxu0 %v991_v22 }
  0x45   :  { %687 = vmatpush.bf16.msra.mxu2 %v1007_v28 }
  0x46   :  { %674 = vmatpush.bf16.msra.mxu1 %v999_v23  ;;  %700 = vmatpush.bf16.msra.mxu3 %v1015_v29 }
  0x47   :  { %662 = vmatpush.bf16.msra.mxu0 %v990_v26 }
  0x49   :  { %688 = vmatpush.bf16.msra.mxu2 %v1006_v32 }
  0x4a   :  { %675 = vmatpush.bf16.msra.mxu1 %v998_v27  ;;  %701 = vmatpush.bf16.msra.mxu3 %v1014_v33 }
  0x4b   :  { %663 = vmatpush.bf16.msra.mxu0 %v989_v30 }
  0x4d   :  { %689 = vmatpush.bf16.msra.mxu2 %v1005_v36 }
  0x4e   :  { %676 = vmatpush.bf16.msra.mxu1 %v997_v31  ;;  %702 = vmatpush.bf16.msra.mxu3 %v1013_v37 }
  0x4f   :  { %664 = vmatpush.bf16.msra.mxu0 %v988_v34 }
  0x51   :  { %690 = vmatpush.bf16.msra.mxu2 %v1004_v40 }
  0x52   :  { %677 = vmatpush.bf16.msra.mxu1 %v996_v35  ;;  %703 = vmatpush.bf16.msra.mxu3 %v1012_v41 }
  0x53   :  { %665 = vmatpush.bf16.msra.mxu0 %v987_v38 }
  0x55   :  { %691 = vmatpush.bf16.msra.mxu2 %v1003_v42 }
  0x56   :  { %678 = vmatpush.bf16.msra.mxu1 %v995_v39  ;;  %704 = vmatpush.bf16.msra.mxu3 %v1011_v43 }
  0xa3   :  { %v197_v44 = vpop.f32.mrf.mxu0 }
  0xa4   :  { %v210_v45 = vpop.f32.mrf.mxu1 }
  0xab   :  { %v223_v46 = vpop.f32.mrf.mxu2  ;;  %v236_v47 = vpop.f32.mrf.mxu3 }
  0xac   :  { %v199_v48 = vpop.f32.mrf.mxu0  ;;  %v212_v49 = vpop.f32.mrf.mxu1 }
  0xb3   :  { %v225_v51 = vpop.f32.mrf.mxu2  ;;  %v238_v52 = vpop.f32.mrf.mxu3 }
  0xb4   :  { %v333_v54 = vpop.f32.mrf.mxu0 }
  0xb5   :  { %v334_v56 = vadd.f32 %v333_v54, %v197_v44 }
  0xb6   :  { %v346_v57 = vpop.f32.mrf.mxu1 }
  0xb7   :  { %v347_v58 = vadd.f32 %v346_v57, %v210_v45  ;;  %v386_v59 = vadd.f32 %v378_v53, %v334_v56 }
  0xb9   :  { %v387_v60 = vadd.f32 %v379_v55, %v347_v58  ;;  %v390_v61 = vmax.f32 %v386_v59, 0.0 }
  0xbb   :  { %v391_v63 = vmax.f32 %v387_v60, 0.0  ;;  %v359_v0 = vpop.f32.mrf.mxu2  ;;  %v394_v2 = vpack.c.bf16 %v390_v61, %v390_v61  ;;  %v372_v4 = vpop.f32.mrf.mxu3 }
  0xbc   :  { %v360_v3 = vadd.f32 %v359_v0, %v223_v46  ;;  %v373_v6 = vadd.f32 %v372_v4, %v236_v47  ;;  %v335_v7 = vpop.f32.mrf.mxu0 }
  0xbd   :  { %v395_v5 = vpack.c.bf16 %v391_v63, %v391_v63  ;;  %666 = vmatmul.bf16.vlgmr.msra.gmra.mxu0 %v394_v2 }
  0xbe   :  { %v388_v8 = vadd.f32 %v380_v62, %v360_v3  ;;  %v348_v9 = vpop.f32.mrf.mxu1  ;;  %v389_v10 = vadd.f32 %v381_v1, %v373_v6 }
  0xbf   :  { %679 = vmatmul.bf16.vlgmr.msra.gmra.mxu1 %v395_v5 }
  0xc0   :  { %v392_v11 = vmax.f32 %v388_v8, 0.0  ;;  %v393_v12 = vmax.f32 %v389_v10, 0.0 }
  0xc2   :  { %v396_v13 = vpack.c.bf16 %v392_v11, %v392_v11  ;;  %v397_v14 = vpack.c.bf16 %v393_v12, %v393_v12 }
  0xc3   :  { %v361_v15 = vpop.f32.mrf.mxu2  ;;  %v374_v16 = vpop.f32.mrf.mxu3 }
  0xc4   :  { %692 = vmatmul.bf16.vlgmr.msra.gmra.mxu2 %v396_v13  ;;  %705 = vmatmul.bf16.vlgmr.msra.gmra.mxu3 %v397_v14 }
 0x13a   :  { %v667_v17 = vpop.f32.mrf.mxu0 }
 0x13b   :  { %v668_v20 = vadd.f32 %v1030_v19, %v667_v17 }
 0x13c   :  { %v680_v18 = vpop.f32.mrf.mxu1 }
 0x13d   :  { %v681_v23 = vadd.f32 %v680_v18, %v668_v20 }
 0x142   :  { %v669_v21 = vpop.f32.mrf.mxu0 }
 0x144   :  { %v682_v22 = vpop.f32.mrf.mxu1 }
 0x147   :  { %v693_v24 = vpop.f32.mrf.mxu2  ;;  %v706_v26 = vpop.f32.mrf.mxu3 }
 0x148   :  { %v694_v25 = vadd.f32 %v693_v24, %v681_v23 }
 0x14a   :  { %v707_v27 = vadd.f32 %v706_v26, %v694_v25 }
 0x14c   :  { %710 = vst [vmem:[#allocation13] sm:$0xff] %v707_v27 }
 0x14d   :  { %721 = dma.vmem_to_hbm [thread:$0]  %s717_s9, 128, %s719_s12, [#allocation4]  }
 0x14f   :  { %v695_v28 = vpop.f32.mrf.mxu2  ;;  %v708_v29 = vpop.f32.mrf.mxu3 }
 0x150   :  { %1207 = dma.done.wait [#allocation4], 128  }
 0x151   :  { %1208 = vsyncadd [#allocation4], 4294967168 }
 0x152   :  { %726 = vsyncpa [#allocation3], 1 }
 0x153   :  { %727 = vsyncpa [#allocation6], 1 }
 0x154   :  { %728 = vsyncpa [#allocation9], 1 }
 0x155   :  { %729 = vsyncpa [#allocation12], 1 }
 0x156   :  { %730 = vsyncpa [#allocation4], 1 }

</bundles_post_ra>
